<compile_context>
chip_gen: v7x
topology: tpu7x:2x2x1
jax: 0.10.0
libtpu: 0.0.40
codegen_flags: <defaults>
</compile_context>

<pallas_src>
import functools

import jax
import jax.numpy as jnp
from jax import lax
from jax.experimental import pallas as pl
from jax.experimental.pallas import tpu as pltpu


def _round_up(a, b):
    return (a + b - 1) // b * b


# ---------------------------------------------------------------------------
# Kernels
# ---------------------------------------------------------------------------
def conv_stats_kernel(x_ref, w_ref, y_ref, stat_ref):
    """Single fused matmul (K = 16*Cin) + per-tile channel sum / sum-of-squares.

    x_ref: (hw_tile, K) bf16   w_ref: (K, cp_tile) bf16
    y_ref: (hw_tile, cp_tile) bf16   stat_ref: (8, cp_tile) f32 (row0=sum, row1=sumsq)
    Conv bias is omitted: it cancels algebraically in BatchNorm.
    """
    acc = jnp.dot(x_ref[...], w_ref[...], preferred_element_type=jnp.float32)
    y_ref[...] = acc.astype(y_ref.dtype)
    s = jnp.sum(acc, axis=0, keepdims=True)
    sq = jnp.sum(acc * acc, axis=0, keepdims=True)
    pad = jnp.zeros((6, acc.shape[1]), jnp.float32)
    stat_ref[...] = jnp.concatenate([s, sq, pad], axis=0)


def bn_lrelu_kernel(y_ref, scale_ref, shift_ref, o_ref):
    """Affine BatchNorm + LeakyReLU(0.2) on a bf16 tile; writes channel-major block."""
    z = y_ref[...].astype(jnp.float32) * scale_ref[...] + shift_ref[...]
    z = jnp.where(z >= 0, z, 0.2 * z)
    o_ref[...] = jnp.transpose(z).astype(o_ref.dtype)


def conv_bias_lrelu_kernel(x_ref, w_ref, b_ref, o_ref):
    """normalize=False path: conv + bias + LeakyReLU fused in one pass."""
    acc = jnp.dot(x_ref[...], w_ref[...], preferred_element_type=jnp.float32)
    acc = acc + b_ref[...]
    z = jnp.where(acc >= 0, acc, 0.2 * acc)
    o_ref[...] = jnp.transpose(z).astype(o_ref.dtype)


# ---------------------------------------------------------------------------
# Wrapper
# ---------------------------------------------------------------------------
@functools.partial(jax.jit, static_argnames=("normalize",))
def unet_down_forward(x, weight, bias, gamma, beta, normalize=True):
    """x: (N, Cin, H, W) f32; weight: (Cout, Cin, 4, 4); bias/gamma/beta: (Cout,)."""
    n, cin, h, w = x.shape
    cout = weight.shape[0]
    # Conv2d(k=4, s=2, p=1): out = floor((H - 2) / 2) + 1 == H // 2 (even or odd H).
    ho, wo = h // 2, w // 2
    hw = ho * wo
    k_dim = 16 * cin                                   # fused contraction: taps x Cin

    # --- tiling ---------------------------------------------------------------
    cp = _round_up(cout, 128)                          # lane-dense output channels
    cp_tile = 256 if cp % 256 == 0 else 128            # MXU-friendly Cout tile
    n_cp = cp // cp_tile
    # ~512 output rows per tile, shrunk if K is huge so the bf16 LHS tile stays <= ~4 MiB.
    max_rows_by_k = max(8, ((4 * 1024 * 1024) // (2 * k_dim)) // 8 * 8)
    hw_tile = min(512, max_rows_by_k)
    if hw <= hw_tile:
        hw_tile = _round_up(hw, 8)
    hwp = _round_up(hw, hw_tile)
    n_hw = hwp // hw_tile

    # --- lane-dense im2col prepass in XLA (single fused pass, bf16) -------------
    xn = jnp.transpose(x, (0, 2, 3, 1))                # NHWC
    xp = jnp.pad(xn, ((0, 0), (1, 1), (1, 1), (0, 0)))  # zero pad=1
    taps = []
    for dh in range(4):
        for dw in range(4):
            taps.append(xp[:, dh:dh + 2 * ho:2, dw:dw + 2 * wo:2, :])   # (N, ho, wo, Cin)
    patches = jnp.stack(taps, axis=3).reshape(n, hw, k_dim)
    if hwp != hw:
        patches = jnp.pad(patches, ((0, 0), (0, hwp - hw), (0, 0)))     # zero rows: inert
    patches = patches.astype(jnp.bfloat16)

    # weight -> (K, Cp): row index = (dh*4+dw)*Cin + c, matching the patch layout.
    wk = jnp.transpose(weight, (2, 3, 1, 0)).reshape(k_dim, cout)
    wk = jnp.pad(wk, ((0, 0), (0, cp - cout))).astype(jnp.bfloat16)

    # --- specs ------------------------------------------------------------------
    grid = (n, n_hw, n_cp)                             # inner axis = Cout tiles
    x_spec = pl.BlockSpec((None, hw_tile, k_dim), lambda b, t, c: (b, t, 0))
    w_spec = pl.BlockSpec((k_dim, cp_tile), lambda b, t, c: (0, c))
    vec_spec = pl.BlockSpec((1, cp_tile), lambda b, t, c: (0, c))
    y_spec = pl.BlockSpec((None, hw_tile, cp_tile), lambda b, t, c: (b, t, c))
    out_spec = pl.BlockSpec((None, cp_tile, hw_tile), lambda b, t, c: (b, c, t))
    cparams = pltpu.CompilerParams(
        dimension_semantics=("parallel", "parallel", "parallel"),
        vmem_limit_bytes=48 * 1024 * 1024)

    if normalize:
        y3d, stats = pl.pallas_call(
            conv_stats_kernel,
            out_shape=(
                jax.ShapeDtypeStruct((n, hwp, cp), jnp.bfloat16),       # bf16 intermediate
                jax.ShapeDtypeStruct((n * n_hw, 8, cp), jnp.float32),   # per-tile partials
            ),
            grid_spec=pltpu.PrefetchScalarGridSpec(
                num_scalar_prefetch=0,
                grid=grid,
                in_specs=[x_spec, w_spec],
                out_specs=[
                    y_spec,
                    pl.BlockSpec((None, 8, cp_tile),
                                 lambda b, t, c: (b * n_hw + t, 0, c)),
                ],
            ),
            compiler_params=cparams,
        )(patches, wk)

        # BatchNorm2d (training-mode batch stats, biased variance over N*Ho*Wo).
        # Padded rows/channels contribute zeros; divide by the true element count.
        m = n * hw
        eps = 1e-5
        csum = jnp.sum(stats[:, 0, :], axis=0)          # (cp,)
        csq = jnp.sum(stats[:, 1, :], axis=0)           # (cp,)
        mean = csum / m
        var = jnp.maximum(csq / m - mean * mean, 0.0)
        inv_std = lax.rsqrt(var + eps)
        gamma_p = jnp.pad(gamma, (0, cp - cout))
        beta_p = jnp.pad(beta, (0, cp - cout))
        scale = (gamma_p * inv_std).reshape(1, cp)
        shift = (beta_p - mean * gamma_p * inv_std).reshape(1, cp)

        out3d = pl.pallas_call(
            bn_lrelu_kernel,
            out_shape=jax.ShapeDtypeStruct((n, cp, hwp), jnp.float32),
            grid_spec=pltpu.PrefetchScalarGridSpec(
                num_scalar_prefetch=0,
                grid=grid,
                in_specs=[y_spec, vec_spec, vec_spec],
                out_specs=out_spec,
            ),
            compiler_params=cparams,
        )(y3d, scale, shift)
    else:
        b_row = jnp.pad(bias, (0, cp - cout)).reshape(1, cp).astype(jnp.float32)
        out3d = pl.pallas_call(
            conv_bias_lrelu_kernel,
            out_shape=jax.ShapeDtypeStruct((n, cp, hwp), jnp.float32),
            grid_spec=pltpu.PrefetchScalarGridSpec(
                num_scalar_prefetch=0,
                grid=grid,
                in_specs=[x_spec, w_spec, vec_spec],
                out_specs=out_spec,
            ),
            compiler_params=cparams,
        )(patches, wk, b_row)

    # Drop channel/spatial padding (no-op when already aligned) and reshape to NCHW.
    return out3d[:, :cout, :hw].reshape(n, cout, ho, wo)


# ---------------------------------------------------------------------------
# Plain-JAX reference (training-mode BatchNorm), for the in-script check.
# ---------------------------------------------------------------------------
def reference_forward(x, weight, bias, gamma, beta, normalize=True):
    y = lax.conv_general_dilated(
        x, weight, window_strides=(2, 2), padding=((1, 1), (1, 1)),
        dimension_numbers=("NCHW", "OIHW", "NCHW"))
    y = y + bias.reshape(1, -1, 1, 1)
    if normalize:
        mean = jnp.mean(y, axis=(0, 2, 3), keepdims=True)
        var = jnp.mean((y - mean) ** 2, axis=(0, 2, 3), keepdims=True)
        y = (y - mean) * lax.rsqrt(var + 1e-5)
        y = y * gamma.reshape(1, -1, 1, 1) + beta.reshape(1, -1, 1, 1)
    return jnp.where(y >= 0, y, 0.2 * y)


if __name__ == "__main__":
    # Small shapes consistent with UNetDown(in_size=4, out_size=8)
    N, Cin, H, W, Cout = 2, 4, 16, 16, 8

    key = jax.random.PRNGKey(0)
    kx, kw, kb = jax.random.split(key, 3)
    x = jax.random.normal(kx, (N, Cin, H, W), jnp.float32)
    weight = 0.1 * jax.random.normal(kw, (Cout, Cin, 4, 4), jnp.float32)
    bias = 0.1 * jax.random.normal(kb, (Cout,), jnp.float32)
    gamma = jnp.ones((Cout,), jnp.float32)   # BatchNorm2d default init
    beta = jnp.zeros((Cout,), jnp.float32)

    # normalize=True path (Conv + BN + LeakyReLU)
    out = jax.block_until_ready(
        unet_down_forward(x, weight, bias, gamma, beta, normalize=True))
    ref = reference_forward(x, weight, bias, gamma, beta, normalize=True)
    assert out.shape == (N, Cout, H // 2, W // 2), out.shape
    # bf16 matmul inputs + bf16 intermediate with f32 stats -> ~1e-2 tolerance
    assert jnp.allclose(out, ref, atol=3e-2, rtol=3e-2), float(jnp.max(jnp.abs(out - ref)))

    # normalize=False path (Conv + bias + LeakyReLU fused in one kernel)
    out_nn = jax.block_until_ready(
        unet_down_forward(x, weight, bias, gamma, beta, normalize=False))
    ref_nn = reference_forward(x, weight, bias, gamma, beta, normalize=False)
    assert out_nn.shape == (N, Cout, H // 2, W // 2), out_nn.shape
    assert jnp.allclose(out_nn, ref_nn, atol=3e-2, rtol=3e-2), \
        float(jnp.max(jnp.abs(out_nn - ref_nn)))

    print("KERNEL_OK")
</pallas_src>

<mosaic_0001>
module attributes {stable_mosaic.version = 11 : i64} {
  func.func @conv_stats_kernel(%arg0: i32, %arg1: i32, %arg2: i32, %arg3: memref<1x64x64xbf16, #tpu.memory_space<vmem>>, %arg4: memref<64x128xbf16, #tpu.memory_space<vmem>>, %arg5: memref<1x64x128xbf16, #tpu.memory_space<vmem>>, %arg6: memref<1x8x128xf32, #tpu.memory_space<vmem>>) attributes {dimension_semantics = [#tpu.dimension_semantics<parallel>, #tpu.dimension_semantics<parallel>, #tpu.dimension_semantics<parallel>], iteration_bounds = array<i64: 2, 1, 1>, scalar_prefetch = 0 : i64, scratch_operands = 0 : i64, tpu.core_type = #tpu.core_type<tc>, window_params = [{transform_indices = @transform_0, window_bounds = array<i64: 1, 64, 64>}, {transform_indices = @transform_1, window_bounds = array<i64: 64, 128>}, {transform_indices = @transform_2, window_bounds = array<i64: 1, 64, 128>}, {transform_indices = @transform_3, window_bounds = array<i64: 1, 8, 128>}]} {
    %c0 = arith.constant 0 : index
    %c0_0 = arith.constant 0 : index
    %c0_1 = arith.constant 0 : index
    %0 = vector.load %arg3[%c0, %c0_0, %c0_1] : memref<1x64x64xbf16, #tpu.memory_space<vmem>>, vector<1x64x64xbf16>
    %1 = vector.shape_cast %0 : vector<1x64x64xbf16> to vector<64x64xbf16>
    %c0_2 = arith.constant 0 : index
    %c0_3 = arith.constant 0 : index
    %2 = vector.load %arg4[%c0_2, %c0_3] : memref<64x128xbf16, #tpu.memory_space<vmem>>, vector<64x128xbf16>
    %cst = arith.constant dense<0.000000e+00> : vector<64x128xf32>
    %3 = tpu.matmul %1, %2, %cst {dimension_numbers = #tpu.dot_dimension_numbers<[1], [0], [0], [1], [0, 0, 1, 1], [], []>} : vector<64x64xbf16>, vector<64x128xbf16>, vector<64x128xf32> -> vector<64x128xf32>
    %4 = arith.truncf %3 : vector<64x128xf32> to vector<64x128xbf16>
    %c0_4 = arith.constant 0 : index
    %c0_5 = arith.constant 0 : index
    %c0_6 = arith.constant 0 : index
    %5 = vector.load %arg5[%c0_4, %c0_5, %c0_6] : memref<1x64x128xbf16, #tpu.memory_space<vmem>>, vector<1x64x128xbf16>
    %6 = vector.shape_cast %5 : vector<1x64x128xbf16> to vector<64x128xbf16>
    %7 = vector.shape_cast %4 : vector<64x128xbf16> to vector<1x64x128xbf16>
    tpu.vector_store %arg5[%c0_4, %c0_5, %c0_6], %7 {strides = array<i32>} : memref<1x64x128xbf16, #tpu.memory_space<vmem>>, vector<1x64x128xbf16>,
    %cst_7 = arith.constant dense<0.000000e+00> : vector<128xf32>
    %8 = vector.multi_reduction <add>, %3, %cst_7 [0] : vector<64x128xf32> to vector<128xf32>
    %9 = vector.shape_cast %8 : vector<128xf32> to vector<1x128xf32>
    %10 = arith.mulf %3, %3 : vector<64x128xf32>
    %cst_8 = arith.constant dense<0.000000e+00> : vector<128xf32>
    %11 = vector.multi_reduction <add>, %10, %cst_8 [0] : vector<64x128xf32> to vector<128xf32>
    %12 = vector.shape_cast %11 : vector<128xf32> to vector<1x128xf32>
    %cst_9 = arith.constant 0.000000e+00 : f32
    %13 = vector.broadcast %cst_9 : f32 to vector<6x128xf32>
    %14 = tpu.concatenate %9, %12, %13 in 0 : vector<1x128xf32>, vector<1x128xf32>, vector<6x128xf32> -> vector<8x128xf32>
    %c0_10 = arith.constant 0 : index
    %c0_11 = arith.constant 0 : index
    %c0_12 = arith.constant 0 : index
    %15 = vector.load %arg6[%c0_10, %c0_11, %c0_12] : memref<1x8x128xf32, #tpu.memory_space<vmem>>, vector<1x8x128xf32>
    %16 = vector.shape_cast %15 : vector<1x8x128xf32> to vector<8x128xf32>
    %17 = vector.shape_cast %14 : vector<8x128xf32> to vector<1x8x128xf32>
    tpu.vector_store %arg6[%c0_10, %c0_11, %c0_12], %17 {strides = array<i32>} : memref<1x8x128xf32, #tpu.memory_space<vmem>>, vector<1x8x128xf32>,
    return
  }
  func.func @transform_0(%arg0: i32, %arg1: i32, %arg2: i32) -> (i32, i32, i32) {
    %c0_i32 = arith.constant 0 : i32
    %c0_i32_0 = arith.constant 0 : i32
    return %arg0, %arg1, %c0_i32 : i32, i32, i32
  }
  func.func @transform_1(%arg0: i32, %arg1: i32, %arg2: i32) -> (i32, i32) {
    %c0_i32 = arith.constant 0 : i32
    %c0_i32_0 = arith.constant 0 : i32
    return %c0_i32, %arg2 : i32, i32
  }
  func.func @transform_2(%arg0: i32, %arg1: i32, %arg2: i32) -> (i32, i32, i32) {
    %c0_i32 = arith.constant 0 : i32
    return %arg0, %arg1, %arg2 : i32, i32, i32
  }
  func.func @transform_3(%arg0: i32, %arg1: i32, %arg2: i32) -> (i32, i32, i32) {
    %c1_i32 = arith.constant 1 : i32
    %0 = arith.muli %arg0, %c1_i32 : i32
    %1 = arith.addi %0, %arg1 : i32
    %c0_i32 = arith.constant 0 : i32
    %c0_i32_0 = arith.constant 0 : i32
    return %1, %c0_i32, %arg2 : i32, i32, i32
  }
}

module attributes {stable_mosaic.version = 11 : i64} {
  func.func @bn_lrelu_kernel(%arg0: i32, %arg1: i32, %arg2: i32, %arg3: memref<1x64x128xbf16, #tpu.memory_space<vmem>>, %arg4: memref<1x128xf32, #tpu.memory_space<vmem>>, %arg5: memref<1x128xf32, #tpu.memory_space<vmem>>, %arg6: memref<1x128x64xf32, #tpu.memory_space<vmem>>) attributes {dimension_semantics = [#tpu.dimension_semantics<parallel>, #tpu.dimension_semantics<parallel>, #tpu.dimension_semantics<parallel>], iteration_bounds = array<i64: 2, 1, 1>, scalar_prefetch = 0 : i64, scratch_operands = 0 : i64, tpu.core_type = #tpu.core_type<tc>, window_params = [{transform_indices = @transform_0, window_bounds = array<i64: 1, 64, 128>}, {transform_indices = @transform_1, window_bounds = array<i64: 1, 128>}, {transform_indices = @transform_2, window_bounds = array<i64: 1, 128>}, {transform_indices = @transform_3, window_bounds = array<i64: 1, 128, 64>}]} {
    %c0 = arith.constant 0 : index
    %c0_0 = arith.constant 0 : index
    %c0_1 = arith.constant 0 : index
    %0 = vector.load %arg3[%c0, %c0_0, %c0_1] : memref<1x64x128xbf16, #tpu.memory_space<vmem>>, vector<1x64x128xbf16>
    %1 = vector.shape_cast %0 : vector<1x64x128xbf16> to vector<64x128xbf16>
    %2 = arith.extf %1 : vector<64x128xbf16> to vector<64x128xf32>
    %c0_2 = arith.constant 0 : index
    %c0_3 = arith.constant 0 : index
    %3 = vector.load %arg4[%c0_2, %c0_3] : memref<1x128xf32, #tpu.memory_space<vmem>>, vector<1x128xf32>
    %4 = vector.broadcast %3 : vector<1x128xf32> to vector<64x128xf32>
    %5 = arith.mulf %2, %4 : vector<64x128xf32>
    %c0_4 = arith.constant 0 : index
    %c0_5 = arith.constant 0 : index
    %6 = vector.load %arg5[%c0_4, %c0_5] : memref<1x128xf32, #tpu.memory_space<vmem>>, vector<1x128xf32>
    %7 = vector.broadcast %6 : vector<1x128xf32> to vector<64x128xf32>
    %8 = arith.addf %5, %7 : vector<64x128xf32>
    %cst = arith.constant 0.000000e+00 : f32
    %9 = vector.broadcast %cst : f32 to vector<64x128xf32>
    %10 = arith.cmpf oge, %8, %9 : vector<64x128xf32>
    %cst_6 = arith.constant 2.000000e-01 : f32
    %11 = vector.broadcast %cst_6 : f32 to vector<64x128xf32>
    %12 = arith.mulf %11, %8 : vector<64x128xf32>
    %13 = arith.select %10, %8, %12 : vector<64x128xi1>, vector<64x128xf32>
    %14 = tpu.transpose %13, [1, 0] : vector<64x128xf32> -> vector<128x64xf32>
    %c0_7 = arith.constant 0 : index
    %c0_8 = arith.constant 0 : index
    %c0_9 = arith.constant 0 : index
    %15 = vector.load %arg6[%c0_7, %c0_8, %c0_9] : memref<1x128x64xf32, #tpu.memory_space<vmem>>, vector<1x128x64xf32>
    %16 = vector.shape_cast %15 : vector<1x128x64xf32> to vector<128x64xf32>
    %17 = vector.shape_cast %14 : vector<128x64xf32> to vector<1x128x64xf32>
    tpu.vector_store %arg6[%c0_7, %c0_8, %c0_9], %17 {strides = array<i32>} : memref<1x128x64xf32, #tpu.memory_space<vmem>>, vector<1x128x64xf32>,
    return
  }
  func.func @transform_0(%arg0: i32, %arg1: i32, %arg2: i32) -> (i32, i32, i32) {
    %c0_i32 = arith.constant 0 : i32
    return %arg0, %arg1, %arg2 : i32, i32, i32
  }
  func.func @transform_1(%arg0: i32, %arg1: i32, %arg2: i32) -> (i32, i32) {
    %c0_i32 = arith.constant 0 : i32
    %c0_i32_0 = arith.constant 0 : i32
    return %c0_i32, %arg2 : i32, i32
  }
  func.func @transform_2(%arg0: i32, %arg1: i32, %arg2: i32) -> (i32, i32) {
    %c0_i32 = arith.constant 0 : i32
    %c0_i32_0 = arith.constant 0 : i32
    return %c0_i32, %arg2 : i32, i32
  }
  func.func @transform_3(%arg0: i32, %arg1: i32, %arg2: i32) -> (i32, i32, i32) {
    %c0_i32 = arith.constant 0 : i32
    return %arg0, %arg2, %arg1 : i32, i32, i32
  }
}

</mosaic_0001>

<bundles_post_ra>
// kernel: unet_down_forward.3
= control target key start
LH: loop header
LB: loop body
LE: loop exit
PB: predicated region body
PF: predicated region fallthrough
CT: control target
= control target key end

     0   :  { %s615_s12 = smov 0   ;;  %s617_s13 = smov 0   ;;  %s692_s0 = inlined_call_operand.vmem [shape: bf16[2,64,128], index: 0, kind: input, shape index: {}]   ;;  %s693_s1 = inlined_call_operand.vmem [shape: f32[1,128], index: 1, kind: input, shape index: {}]   ;;  %s694_s2 = inlined_call_operand.vmem [shape: f32[1,128], index: 2, kind: input, shape index: {}]   ;;  %s695_s3 = inlined_call_operand.vmem [shape: f32[2,128,64], index: 3, kind: output, shape index: {}]  }
   0x1   :  { %s619_s14 = smov 0  }
   0x2 LB: > { %s32_s15 = sadd.s32 1, %s589_s13  ;;  %p516_p0 = scmp.ge.s32.totalorder %s593_s14, 1  ;;  %s593_s14 = sphi %s619_s14, %s13_s14   ;;  %s589_s13 = sphi %s617_s13, %s697_s13   ;;  %s585_s12 = sphi %s615_s12, %s696_s12  }
   0x3   : > { %p34_p1 = scmp.ge.s32.totalorder %s32_s15, 2  ;;  %p188_p2 = scmp.lt.s32.totalorder %s593_s14, 3 }
   0x5   : > { %s699_s15 = smov (%p34_p1, %s32_s15), 0  ;;  %p189_p3 = pnand %p516_p0, %p188_p2 }
   0x6   : > { %p233_p4 = scmp.lt.s32.totalorder (!%p189_p3), %s585_s12, 1  ;;  %v521_v1 = vld [vmem:[%s693_s1] ss:$0 sm:$0xff] (!%p189_p3)  ;;  %vm366_vm8 = vcmask (!%p189_p3), 523264  }
   0x7   : > { %192 = sbr.rel (%p189_p3) target bundleno = 217 (0xd9), region = 32  ;;  %v522_v6 = vld [vmem:[%s694_s2] ss:$0 sm:$0xff] (!%p189_p3) }
   0xe   : > { %s701_s12 = smov (!%p233_p4, %s585_s12), 1 }
   0xf   : > { %s525_s16 = sshll.u32 %s701_s12, 5  ;;  %s526_s24 = sshll.u32 %s701_s12, 7 }
  0x10   : > { %s243_s19 = scalar_lea.vmem %s692_s0, %s525_s16  ;;  %s649_s27 = scalar_lea.vmem %s695_s3, %s526_s24 }
  0x11   : > { %v528_v0 = vld [vmem:[%s243_s19] sm:$0xff]   ;;  %v543_v2 = vld [vmem:[%s243_s19 + $0x8] sm:$0xff]   ;;  %v544_v11 = vld [vmem:[%s243_s19 + $0x10] sm:$0xff]  }
  0x12   : > { %v529_v3 = vunpack.c.l.bf16 %v528_v0  ;;  %v530_v4 = vunpack.c.h.bf16 %v528_v0  ;;  %v533_v5 = vunpack.c.l.bf16 %v543_v2  ;;  %v534_v7 = vunpack.c.h.bf16 %v543_v2  ;;  %v545_v25 = vld [vmem:[%s243_s19 + $0x18] sm:$0xff]  }
  0x13   : > { %v537_v15 = vunpack.c.l.bf16 %v544_v11  ;;  %v538_v20 = vunpack.c.h.bf16 %v544_v11  ;;  %v541_v26 = vunpack.c.l.bf16 %v545_v25  ;;  %v542_v31 = vunpack.c.h.bf16 %v545_v25 }
  0x14   : > { %v287_v8 = vmul.f32 %v529_v3, %v521_v1  ;;  %v288_v9 = vmul.f32 %v530_v4, %v521_v1  ;;  %v289_v10 = vmul.f32 %v533_v5, %v521_v1  ;;  %v290_v14 = vmul.f32 %v534_v7, %v521_v1 }
  0x15   : > { %v291_v24 = vmul.f32 %v537_v15, %v521_v1  ;;  %v292_v30 = vmul.f32 %v538_v20, %v521_v1  ;;  %v293_v35 = vmul.f32 %v541_v26, %v521_v1  ;;  %v294_v39 = vmul.f32 %v542_v31, %v521_v1 }
  0x16   : > { %v302_v12 = vadd.f32 %v522_v6, %v287_v8  ;;  %v303_v13 = vadd.f32 %v522_v6, %v288_v9  ;;  %v304_v18 = vadd.f32 %v522_v6, %v289_v10  ;;  %v305_v23 = vadd.f32 %v522_v6, %v290_v14 }
  0x17   : > { %v306_v29 = vadd.f32 %v522_v6, %v291_v24  ;;  %v307_v34 = vadd.f32 %v522_v6, %v292_v30  ;;  %v308_v38 = vadd.f32 %v522_v6, %v293_v35  ;;  %v309_v42 = vadd.f32 %v522_v6, %v294_v39 }
  0x18   : > { %vm310_vm0 = vcmp.ge.f32.partialorder %v302_v12, 0.0  ;;  %v318_v16 = vmul.f32 0.2, %v302_v12  ;;  %v319_v17 = vmul.f32 0.2, %v303_v13  ;;  %vm311_vm1 = vcmp.ge.f32.partialorder %v303_v13, 0.0 }
  0x19   : > { %v320_v22 = vmul.f32 0.2, %v304_v18  ;;  %vm312_vm2 = vcmp.ge.f32.partialorder %v304_v18, 0.0  ;;  %v321_v28 = vmul.f32 0.2, %v305_v23  ;;  %vm313_vm3 = vcmp.ge.f32.partialorder %v305_v23, 0.0 }
  0x1a   : > { %v326_v19 = vsel %vm310_vm0, %v302_v12, %v318_v16  ;;  %v327_v21 = vsel %vm311_vm1, %v303_v13, %v319_v17  ;;  %v322_v33 = vmul.f32 0.2, %v306_v29  ;;  %vm314_vm4 = vcmp.ge.f32.partialorder %v306_v29, 0.0 }
  0x1b   : > { %334 = vxpose.xlu0.b32.start [1/8] (short) %v326_v19, 128  ;;  %v328_v27 = vsel %vm312_vm2, %v304_v18, %v320_v22  ;;  %v329_v32 = vsel %vm313_vm3, %v305_v23, %v321_v28  ;;  %v323_v37 = vmul.f32 0.2, %v307_v34  ;;  %vm315_vm5 = vcmp.ge.f32.partialorder %v307_v34, 0.0 }
  0x1c   : > { %v330_v36 = vsel %vm314_vm4, %v306_v29, %v322_v33  ;;  %v324_v41 = vmul.f32 0.2, %v308_v38  ;;  %vm316_vm6 = vcmp.ge.f32.partialorder %v308_v38, 0.0  ;;  %v325_v44 = vmul.f32 0.2, %v309_v42 }
  0x1d   : > { %v331_v40 = vsel %vm315_vm5, %v307_v34, %v323_v37  ;;  %vm317_vm7 = vcmp.ge.f32.partialorder %v309_v42, 0.0 }
  0x1e   : > { %v332_v43 = vsel %vm316_vm6, %v308_v38, %v324_v41  ;;  %v333_v45 = vsel %vm317_vm7, %v309_v42, %v325_v44 }
  0x1f   : > { %335 = vxpose.xlu0.b32.cont [2/8] (short) %v327_v21, 128 }
  0x23   : > { %336 = vxpose.xlu0.b32.cont [3/8] (short) %v328_v27, 128 }
  0x27   : > { %337 = vxpose.xlu0.b32.cont [4/8] (short) %v329_v32, 128 }
  0x2b   : > { %338 = vxpose.xlu0.b32.cont [5/8] (short) %v330_v36, 128 }
  0x2f   : > { %339 = vxpose.xlu0.b32.cont [6/8] (short) %v331_v40, 128 }
  0x33   : > { %340 = vxpose.xlu0.b32.cont [7/8] (short) %v332_v43, 128 }
  0x37   : > { %341 = vxpose.xlu0.b32.end [8/8] (short) %v333_v45, 128 }
  0x9b   : > { %v350_v46 = vpop.trf.xlu0 }
  0x9c   : > { %367 = vst.msk [vmem:[%s649_s27] sm:$0xff] %vm366_vm8, %v350_v46 }
  0x9f   : > { %v351_v47 = vpop.trf.xlu0 }
  0xa0   : > { %368 = vst.msk [vmem:[%s649_s27 + $0x8] sm:$0xff] %vm366_vm8, %v351_v47 }
  0xa3   : > { %v352_v48 = vpop.trf.xlu0 }
  0xa4   : > { %369 = vst.msk [vmem:[%s649_s27 + $0x10] sm:$0xff] %vm366_vm8, %v352_v48 }
  0xa7   : > { %v353_v49 = vpop.trf.xlu0 }
  0xa8   : > { %370 = vst.msk [vmem:[%s649_s27 + $0x18] sm:$0xff] %vm366_vm8, %v353_v49 }
  0xab   : > { %v354_v50 = vpop.trf.xlu0 }
  0xac   : > { %371 = vst.msk [vmem:[%s649_s27 + $0x20] sm:$0xff] %vm366_vm8, %v354_v50 }
  0xaf   : > { %v355_v51 = vpop.trf.xlu0 }
  0xb0   : > { %372 = vst.msk [vmem:[%s649_s27 + $0x28] sm:$0xff] %vm366_vm8, %v355_v51 }
  0xb3   : > { %v356_v52 = vpop.trf.xlu0 }
  0xb4   : > { %373 = vst.msk [vmem:[%s649_s27 + $0x30] sm:$0xff] %vm366_vm8, %v356_v52 }
  0xb7   : > { %v357_v53 = vpop.trf.xlu0 }
  0xb8   : > { %374 = vst.msk [vmem:[%s649_s27 + $0x38] sm:$0xff] %vm366_vm8, %v357_v53 }
  0xbb   : > { %v358_v54 = vpop.trf.xlu0 }
  0xbc   : > { %375 = vst.msk [vmem:[%s649_s27 + $0x40] sm:$0xff] %vm366_vm8, %v358_v54 }
  0xbf   : > { %v359_v55 = vpop.trf.xlu0 }
  0xc0   : > { %376 = vst.msk [vmem:[%s649_s27 + $0x48] sm:$0xff] %vm366_vm8, %v359_v55 }
  0xc3   : > { %v360_v56 = vpop.trf.xlu0 }
  0xc4   : > { %377 = vst.msk [vmem:[%s649_s27 + $0x50] sm:$0xff] %vm366_vm8, %v360_v56 }
  0xc7   : > { %v361_v57 = vpop.trf.xlu0 }
  0xc8   : > { %378 = vst.msk [vmem:[%s649_s27 + $0x58] sm:$0xff] %vm366_vm8, %v361_v57 }
  0xcb   : > { %v362_v58 = vpop.trf.xlu0 }
  0xcc   : > { %379 = vst.msk [vmem:[%s649_s27 + $0x60] sm:$0xff] %vm366_vm8, %v362_v58 }
  0xcf   : > { %v363_v59 = vpop.trf.xlu0 }
  0xd0   : > { %380 = vst.msk [vmem:[%s649_s27 + $0x68] sm:$0xff] %vm366_vm8, %v363_v59 }
  0xd3   : > { %v364_v60 = vpop.trf.xlu0 }
  0xd4   : > { %381 = vst.msk [vmem:[%s649_s27 + $0x70] sm:$0xff] %vm366_vm8, %v364_v60 }
  0xd7   : > { %v365_v61 = vpop.trf.xlu0 }
  0xd8   : > { %382 = vst.msk [vmem:[%s649_s27 + $0x78] sm:$0xff] %vm366_vm8, %v365_v61 }
  0xd9 PF: > { %s13_s14 = sadd.s32 1, %s593_s14   ;;  %s696_s12 = smov %s589_s13 }
  0xda   : > { %p10_p5 = scmp.ge.s32.totalorder %s13_s14, 4   ;;  %s697_s13 = smov %s699_s15 }
  0xdc   :  { %12 = sbr.rel (!%p10_p5) target bundleno = 2 (0x2), region = 68 }

// kernel: unet_down_forward.2
= control target key start
LH: loop header
LB: loop body
LE: loop exit
PB: predicated region body
PF: predicated region fallthrough
CT: control target
= control target key end

     0   :  { %s817_s12 = smov 0   ;;  %s819_s13 = smov 0   ;;  %s873_s0 = inlined_call_operand.vmem [shape: bf16[2,64,64], index: 0, kind: input, shape index: {}]   ;;  %s874_s1 = inlined_call_operand.vmem [shape: bf16[64,128], index: 1, kind: input, shape index: {}]   ;;  %s875_s2 = inlined_call_operand.vmem [shape: bf16[2,64,128], index: 2, kind: output, shape index: {0}]   ;;  %s876_s3 = inlined_call_operand.vmem [shape: f32[2,8,128], index: 3, kind: output, shape index: {1}]  }
   0x1   :  { %s821_s14 = smov 0  }
   0x2 LB: > { %s33_s15 = sadd.s32 1, %s791_s13  ;;  %p648_p0 = scmp.ge.s32.totalorder %s795_s14, 1  ;;  %s795_s14 = sphi %s821_s14, %s14_s14   ;;  %s791_s13 = sphi %s819_s13, %s878_s13   ;;  %s787_s12 = sphi %s817_s12, %s877_s12  }
   0x3   : > { %p35_p1 = scmp.ge.s32.totalorder %s33_s15, 2  ;;  %p183_p2 = scmp.lt.s32.totalorder %s795_s14, 3 }
   0x5   : > { %s880_s15 = smov (%p35_p1, %s33_s15), 0  ;;  %p184_p3 = pnand %p648_p0, %p183_p2 }
   0x6   : > { %v765_v0 = vld [vmem:[%s874_s1] sm:$0xff] (!%p184_p3)   ;;  %p231_p4 = scmp.lt.s32.totalorder (!%p184_p3), %s787_s12, 1  ;;  %v766_v1 = vld [vmem:[%s874_s1 + $0x8] sm:$0xff] (!%p184_p3)   ;;  %v767_v2 = vld [vmem:[%s874_s1 + $0x10] sm:$0xff] (!%p184_p3)   ;;  %vm327_vm0 = vcmask (!%p184_p3), 523264   ;;  %vm479_vm1 = vcmask (!%p184_p3), 1040384  }
   0x7   : > { %187 = sbr.rel (%p184_p3) target bundleno = 269 (0x10d), region = 28  ;;  %717 = vmatprep.subr.bf16.mxu0 (!%p184_p3), %v765_v0  ;;  %733 = vmatprep.subr.bf16.mxu1 (!%p184_p3), %v765_v0  ;;  %v768_v4 = vld [vmem:[%s874_s1 + $0x18] sm:$0xff] (!%p184_p3)   ;;  %vm481_vm2 = vcmask (!%p184_p3), 1041408  }
   0x8   : > { %718 = vmatpush3.bf16.msra.mxu0 (!%p184_p3), %v765_v0  ;;  %737 = vmatpush3.bf16.msra.mxu1 (!%p184_p3), %v765_v0 }
   0x9   : > { %719 = vmatprep.subr.bf16.mxu0 (!%p184_p3), %v766_v1  ;;  %734 = vmatprep.subr.bf16.mxu1 (!%p184_p3), %v766_v1 }
   0xc   : > { %720 = vmatpush3.bf16.msra.mxu0 (!%p184_p3), %v766_v1  ;;  %738 = vmatpush3.bf16.msra.mxu1 (!%p184_p3), %v766_v1 }
   0xd   : > { %721 = vmatprep.subr.bf16.mxu0 (!%p184_p3), %v767_v2  ;;  %735 = vmatprep.subr.bf16.mxu1 (!%p184_p3), %v767_v2 }
   0xe   : > { %s882_s12 = smov (!%p231_p4, %s787_s12), 1 }
   0xf   : > { %s676_s22 = sshll.u32 %s882_s12, 5  ;;  %s653_s4 = sshll.u32 %s882_s12, 3 }
  0x10   : > { %s238_s25 = scalar_lea.vmem %s873_s0, %s676_s22  ;;  %722 = vmatpush3.bf16.msra.mxu0 %v767_v2  ;;  %739 = vmatpush3.bf16.msra.mxu1 %v767_v2  ;;  %s255_s30 = scalar_lea.vmem %s875_s2, %s676_s22 }
  0x11   : > { %v769_v3 = vld [vmem:[%s238_s25] sm:$0xff]   ;;  %v771_v5 = vld [vmem:[%s238_s25 + $0x10] sm:$0xff]   ;;  %723 = vmatprep.subr.bf16.mxu0 %v768_v4  ;;  %736 = vmatprep.subr.bf16.mxu1 %v768_v4  ;;  %v770_v6 = vld [vmem:[%s238_s25 + $0x8] sm:$0xff]   ;;  %s264_s7 = scalar_lea.vmem %s876_s3, %s653_s4 }
  0x12   : > { %725 = vmatprep.mubr.msk.bf16.mxu0 %vm327_vm0, %v769_v3  ;;  %729 = vmatprep.mubr.msk.bf16.mxu1 %vm327_vm0, %v771_v5  ;;  %v772_v7 = vld [vmem:[%s238_s25 + $0x18] sm:$0xff]  }
  0x14   : > { %724 = vmatpush3.bf16.msra.mxu0 %v768_v4  ;;  %740 = vmatpush3.bf16.msra.mxu1 %v768_v4 }
  0x17   : > { %726 = vmatmul.mubr.msk.bf16.vlgmr.msra.gmra.mrb[0].mxu0 %vm327_vm0, %v770_v6  ;;  %730 = vmatmul.mubr.msk.bf16.vlgmr.msra.gmra.mrb[0].mxu1 %vm327_vm0, %v772_v7 }
  0xea   : > { %v727_v8 = vpop.f32.mrb[0].mxu0  ;;  %v731_v9 = vpop.f32.mrb[0].mxu1 }
  0xeb   : > { %v374_v10 = vpop.f32.mrb[1].mxu0  ;;  %v390_v11 = vpop.f32.mrb[1].mxu1  ;;  %v460_v23 = vmul.f32 %v727_v8, %v727_v8  ;;  %v464_v35 = vmul.f32 %v731_v9, %v731_v9 }
  0xec   : > { %v728_v12 = vpop.f32.mrb[2].mxu0  ;;  %v732_v13 = vpop.f32.mrb[2].mxu1  ;;  %v458_v14 = vmul.f32 %v374_v10, %v374_v10  ;;  %v462_v29 = vmul.f32 %v390_v11, %v390_v11 }
  0xed   : > { %v694_v15 = vpack.c.bf16 %v728_v12, %v727_v8  ;;  %v377_v16 = vpop.f32.mrb[3].mxu0  ;;  %v704_v17 = vpack.c.bf16 %v732_v13, %v731_v9  ;;  %v393_v18 = vpop.f32.mrb[3].mxu1  ;;  %v461_v26 = vmul.f32 %v728_v12, %v728_v12  ;;  %v465_v38 = vmul.f32 %v732_v13, %v732_v13 }
  0xee   : > { %v689_v19 = vpack.c.bf16 %v377_v16, %v374_v10  ;;  %v445_v20 = vadd.f32 %v377_v16, %v374_v10  ;;  %v459_v21 = vmul.f32 %v377_v16, %v377_v16  ;;  %v699_v22 = vpack.c.bf16 %v393_v18, %v390_v11 }
  0xef   : > { %706 = vst [vmem:[%s255_s30 + $0x8] sm:$0xff] %v694_v15   ;;  %708 = vst [vmem:[%s255_s30 + $0x18] sm:$0xff] %v704_v17   ;;  %v463_v34 = vmul.f32 %v393_v18, %v393_v18 }
  0xf0   : > { %690 = vst [vmem:[%s255_s30] sm:$0xff] %v689_v19   ;;  %v446_v24 = vadd.f32 %v727_v8, %v445_v20  ;;  %v466_v25 = vadd.f32 %v459_v21, %v458_v14  ;;  %707 = vst [vmem:[%s255_s30 + $0x10] sm:$0xff] %v699_v22  }
  0xf2   : > { %v467_v27 = vadd.f32 %v466_v25, %v460_v23  ;;  %v447_v28 = vadd.f32 %v728_v12, %v446_v24 }
  0xf4   : > { %v448_v30 = vadd.f32 %v447_v28, %v390_v11  ;;  %v468_v31 = vadd.f32 %v467_v27, %v461_v26 }
  0xf6   : > { %v469_v32 = vadd.f32 %v468_v31, %v462_v29  ;;  %v449_v33 = vadd.f32 %v448_v30, %v393_v18 }
  0xf8   : > { %v450_v36 = vadd.f32 %v731_v9, %v449_v33  ;;  %v470_v37 = vadd.f32 %v469_v32, %v463_v34 }
  0xfa   : > { %v451_v39 = vadd.f32 %v732_v13, %v450_v36  ;;  %v471_v40 = vadd.f32 %v470_v37, %v464_v35 }
  0xfc   : > { %v452_v41 = vrot.slane %v451_v39, 4  ;;  %v472_v42 = vadd.f32 %v471_v40, %v465_v38 }
  0xfe   : > { %v453_v43 = vadd.f32 %v452_v41, %v451_v39  ;;  %v473_v44 = vrot.slane %v472_v42, 4 }
 0x100   : > { %v454_v45 = vrot.slane %v453_v43, 2  ;;  %v474_v46 = vadd.f32 %v473_v44, %v472_v42 }
 0x102   : > { %v455_v47 = vadd.f32 %v454_v45, %v453_v43  ;;  %v475_v48 = vrot.slane %v474_v46, 2 }
 0x104   : > { %v456_v49 = vrot.slane %v455_v47, 1  ;;  %v476_v50 = vadd.f32 %v475_v48, %v474_v46 }
 0x106   : > { %v477_v51 = vrot.slane %v476_v50, 1  ;;  %v457_v52 = vadd.f32 %v456_v49, %v455_v47 }
 0x108   : > { %v478_v53 = vadd.f32 %v477_v51, %v476_v50 }
 0x10a   : > { %v480_v54 = vsel %vm479_vm1, %v457_v52, %v478_v53 }
 0x10b   : > { %v482_v55 = vsel %vm481_vm2, %v480_v54, 0.0 }
 0x10c   : > { %483 = vst [vmem:[%s264_s7] sm:$0xff] %v482_v55 }
 0x10d PF: > { %s14_s14 = sadd.s32 1, %s795_s14   ;;  %s877_s12 = smov %s791_s13 }
 0x10e   : > { %p11_p5 = scmp.ge.s32.totalorder %s14_s14, 4   ;;  %s878_s13 = smov %s880_s15 }
 0x110   :  { %13 = sbr.rel (!%p11_p5) target bundleno = 2 (0x2), region = 73 }

</bundles_post_ra>
